<compile_context>
chip_gen: v7x
topology: tpu7x:2x2x1
jax: 0.10.0
libtpu: 0.0.40
codegen_flags: <defaults>
</compile_context>

<pallas_src>
import jax
import jax.numpy as jnp
from jax.experimental import pallas as pl
from jax.experimental.pallas import tpu as pltpu

_LANES = 128
# One prob tile's byte budget (double-buffered by the pipeline => 2x this).
# 8 MiB x 2 = 16 MiB comfortably fits every generation's scoped VMEM.
_TILE_BYTES_BUDGET = 8 * 1024 * 1024
_MAX_TILE_N = 1024  # ~85%+ of HBM roofline per measured tiled mem-bound kernels
_VMEM_LIMIT_BYTES = 32 * 1024 * 1024


def _nll_loss_kernel(prob_ref, weight_ref, target_ref, out_ref):
    """prob (TILE_N, C) native dtype, weight (1, C) f32, target (TILE_N, 1) i32,
    out (1, 1, 128) f32 per-tile partial-sum slab (live value in lane 0)."""
    prob = prob_ref[...].astype(jnp.float32)   # cast after load; accumulate in f32
    w = weight_ref[...]                        # (1, C) f32
    t = target_ref[...]                        # (TILE_N, 1) i32

    tn, c = prob.shape
    col = jax.lax.broadcasted_iota(jnp.int32, (tn, c), 1)
    # Fused one-hot select; padded rows have t == -1 and match nothing.
    masked = jnp.where(col == t, prob, 0.0)                    # (TILE_N, C)
    # Reduce rows first, then one (1, C) multiply by the class weights.
    partial = jnp.sum(jnp.sum(masked, axis=0, keepdims=True) * w)

    lane = jax.lax.broadcasted_iota(jnp.int32, out_ref.shape, 2)
    out_ref[...] = jnp.where(lane == 0, partial, 0.0)          # lane-dense store


def _pick_tile_n(n: int, c: int, itemsize: int) -> int:
    """Largest multiple-of-8 row tile whose prob slab fits the VMEM budget."""
    tile = _TILE_BYTES_BUDGET // max(1, c * itemsize)
    tile = max(8, min(tile, _MAX_TILE_N))
    tile = (tile // 8) * 8
    n_pad8 = ((n + 7) // 8) * 8
    return min(tile, n_pad8)


def nll_loss(prob: jax.Array, target: jax.Array, weight: jax.Array) -> jax.Array:
    """prob: (N, C) float, target: (N,) int, weight: (C,) float -> scalar f32."""
    n, c = prob.shape
    itemsize = jnp.dtype(prob.dtype).itemsize
    tile_n = _pick_tile_n(n, c, itemsize)
    num_tiles = pl.cdiv(n, tile_n)
    n_pad = num_tiles * tile_n

    target = target.astype(jnp.int32)
    if n_pad != n:
        prob = jnp.pad(prob, ((0, n_pad - n), (0, 0)))
        target = jnp.pad(target, (0, n_pad - n), constant_values=-1)

    weight2d = weight.astype(jnp.float32).reshape(1, c)   # tiny, f32 is fine
    target2d = target.reshape(n_pad, 1)

    partials = pl.pallas_call(
        _nll_loss_kernel,
        out_shape=jax.ShapeDtypeStruct((num_tiles, 1, _LANES), jnp.float32),
        grid=(num_tiles,),
        in_specs=[
            pl.BlockSpec((tile_n, c), lambda i: (i, 0)),   # prob tile
            pl.BlockSpec((1, c), lambda i: (0, 0)),        # weight (replicated)
            pl.BlockSpec((tile_n, 1), lambda i: (i, 0)),   # target tile
        ],
        out_specs=pl.BlockSpec((1, 1, _LANES), lambda i: (i, 0, 0)),
        compiler_params=pltpu.CompilerParams(
            dimension_semantics=("parallel",),
            vmem_limit_bytes=_VMEM_LIMIT_BYTES,
        ),
    )(prob, weight2d, target2d)

    # Final reduction of per-tile partial sums + negation (trivial scalar work).
    return -jnp.sum(partials)


if __name__ == "__main__":
    key = jax.random.PRNGKey(0)
    k_logits, k_weight, k_target = jax.random.split(key, 3)

    N, C = 8, 32
    # "prob" in the original module is typically log-probabilities; use
    # log_softmax of random logits for a realistic deterministic input.
    logits = jax.random.normal(k_logits, (N, C), dtype=jnp.float32)
    prob = jax.nn.log_softmax(logits, axis=-1)
    weight = jax.random.uniform(k_weight, (C,), dtype=jnp.float32)
    target = jax.random.randint(k_target, (N,), 0, C, dtype=jnp.int32)

    loss = nll_loss(prob, target, weight)
    jax.block_until_ready(loss)

    # Pure-JAX reference check.
    ref = -jnp.sum(weight[target] * prob[jnp.arange(N), target])
    assert jnp.allclose(loss, ref, rtol=1e-5, atol=1e-5), (loss, ref)

    print("KERNEL_OK")
</pallas_src>

<mosaic_0001>
module attributes {stable_mosaic.version = 11 : i64} {
  func.func @_nll_loss_kernel(%arg0: i32, %arg1: memref<8x32xf32, #tpu.memory_space<vmem>>, %arg2: memref<1x32xf32, #tpu.memory_space<vmem>>, %arg3: memref<8x1xi32, #tpu.memory_space<vmem>>, %arg4: memref<1x1x128xf32, #tpu.memory_space<vmem>>) attributes {dimension_semantics = [#tpu.dimension_semantics<parallel>], iteration_bounds = array<i64: 1>, scalar_prefetch = 0 : i64, scratch_operands = 0 : i64, tpu.core_type = #tpu.core_type<tc>, window_params = [{transform_indices = @transform_0, window_bounds = array<i64: 8, 32>}, {pipeline_mode = #tpu.pipeline_mode<synchronous>, transform_indices = @transform_1, window_bounds = array<i64: 1, 32>}, {transform_indices = @transform_2, window_bounds = array<i64: 8, 1>}, {transform_indices = @transform_3, window_bounds = array<i64: 1, 1, 128>}]} {
    %c0 = arith.constant 0 : index
    %c0_0 = arith.constant 0 : index
    %0 = vector.load %arg1[%c0, %c0_0] : memref<8x32xf32, #tpu.memory_space<vmem>>, vector<8x32xf32>
    %c0_1 = arith.constant 0 : index
    %c0_2 = arith.constant 0 : index
    %1 = vector.load %arg2[%c0_1, %c0_2] : memref<1x32xf32, #tpu.memory_space<vmem>>, vector<1x32xf32>
    %c0_3 = arith.constant 0 : index
    %c0_4 = arith.constant 0 : index
    %2 = vector.load %arg3[%c0_3, %c0_4] : memref<8x1xi32, #tpu.memory_space<vmem>>, vector<8x1xi32>
    %3 = tpu.iota {dimensions = array<i32: 1>} : vector<8x32xi32>
    %4 = vector.broadcast %2 : vector<8x1xi32> to vector<8x32xi32>
    %5 = arith.cmpi eq, %3, %4 : vector<8x32xi32>
    %cst = arith.constant 0.000000e+00 : f32
    %6 = vector.broadcast %cst : f32 to vector<8x32xf32>
    %7 = arith.select %5, %0, %6 : vector<8x32xi1>, vector<8x32xf32>
    %cst_5 = arith.constant dense<0.000000e+00> : vector<32xf32>
    %8 = vector.multi_reduction <add>, %7, %cst_5 [0] : vector<8x32xf32> to vector<32xf32>
    %9 = vector.shape_cast %8 : vector<32xf32> to vector<1x32xf32>
    %10 = arith.mulf %9, %1 : vector<1x32xf32>
    %11 = vector.shape_cast %10 : vector<1x32xf32> to vector<1x1x32xf32>
    %cst_6 = arith.constant dense<0.000000e+00> : vector<1xf32>
    %12 = vector.multi_reduction <add>, %11, %cst_6 [1, 2] : vector<1x1x32xf32> to vector<1xf32>
    %13 = vector.shape_cast %12 : vector<1xf32> to vector<1x1x1xf32>
    %14 = vector.extract %13[0, 0, 0] : f32 from vector<1x1x1xf32>
    %15 = tpu.iota {dimensions = array<i32: 2>} : vector<1x1x128xi32>
    %c0_i32 = arith.constant 0 : i32
    %16 = vector.broadcast %c0_i32 : i32 to vector<1x1x128xi32>
    %17 = arith.cmpi eq, %15, %16 : vector<1x1x128xi32>
    %cst_7 = arith.constant 0.000000e+00 : f32
    %18 = vector.broadcast %14 : f32 to vector<1x1x128xf32>
    %19 = vector.broadcast %cst_7 : f32 to vector<1x1x128xf32>
    %20 = arith.select %17, %18, %19 : vector<1x1x128xi1>, vector<1x1x128xf32>
    %c0_8 = arith.constant 0 : index
    %c0_9 = arith.constant 0 : index
    %c0_10 = arith.constant 0 : index
    %21 = vector.load %arg4[%c0_8, %c0_9, %c0_10] : memref<1x1x128xf32, #tpu.memory_space<vmem>>, vector<1x1x128xf32>
    tpu.vector_store %arg4[%c0_8, %c0_9, %c0_10], %20 {strides = array<i32>} : memref<1x1x128xf32, #tpu.memory_space<vmem>>, vector<1x1x128xf32>,
    return
  }
  func.func @transform_0(%arg0: i32) -> (i32, i32) {
    %c0_i32 = arith.constant 0 : i32
    %c0_i32_0 = arith.constant 0 : i32
    return %arg0, %c0_i32 : i32, i32
  }
  func.func @transform_1(%arg0: i32) -> (i32, i32) {
    %c0_i32 = arith.constant 0 : i32
    %c0_i32_0 = arith.constant 0 : i32
    %c0_i32_1 = arith.constant 0 : i32
    return %c0_i32, %c0_i32_0 : i32, i32
  }
  func.func @transform_2(%arg0: i32) -> (i32, i32) {
    %c0_i32 = arith.constant 0 : i32
    %c0_i32_0 = arith.constant 0 : i32
    return %arg0, %c0_i32 : i32, i32
  }
  func.func @transform_3(%arg0: i32) -> (i32, i32, i32) {
    %c0_i32 = arith.constant 0 : i32
    %c0_i32_0 = arith.constant 0 : i32
    %c0_i32_1 = arith.constant 0 : i32
    return %arg0, %c0_i32, %c0_i32_0 : i32, i32, i32
  }
}

</mosaic_0001>

<bundles_post_ra>
// kernel: tpu_custom_call.1
= control target key start
LH: loop header
LB: loop body
LE: loop exit
PB: predicated region body
PF: predicated region fallthrough
CT: control target
= control target key end

     0   :  { %s135_s0 = inlined_call_operand.vmem [shape: f32[8,32], index: 0, kind: input, shape index: {}]   ;;  %s136_s1 = inlined_call_operand.vmem [shape: f32[1,32], index: 1, kind: input, shape index: {}]   ;;  %s137_s2 = inlined_call_operand.vmem [shape: s32[8,1], index: 2, kind: input, shape index: {}]   ;;  %s138_s3 = inlined_call_operand.hbm [shape: f32[1,1,128], index: 3, kind: output, shape index: {}]  }
   0x1   :  { %v17_v0 = vld [vmem:[%s137_s2] sm:$0xff] }
   0x2   :  { %8 = vsyncpa [#allocation3], 0  ;;  %v92_v1 = vmov 0   ;;  %v18_v2 = vlaneseq  ;;  %v15_v4 = vld [vmem:[%s135_s0] sm:$0xff]  ;;  %vm25_vm0 = vcmask 261120   ;;  %vm34_vm2 = vcmask 253952  }
   0x3   :  { %67 = vset.pattern.permute.xlu0 %v92_v1  ;;  %v16_v13 = vld [vmem:[%s136_s1] sm:$0x1]  ;;  %s93_s0 = smov [#allocation2]  }
   0x4   :  { %21 = vperm.xlu0 %67, %v17_v0   ;;  %v19_v3 = vand.u32 127, %v18_v2  ;;  %s55_s17 = sshll.u32 %s93_s0, 4  ;;  %s56_s17 = int_to_ptr.vmem [resolvable:$true] %s55_s17 }
   0x5   :  { %s68_s1 = scalar_lea.vmem %s56_s17, 16  ;;  %s72_s19 = scalar_lea.vmem %s56_s17, 32 }
   0x6   :  { %vm45_vm3 = vcmp.eq.s32.totalorder %v19_v3, 0  ;;  %p69_p0 = scmp.ne.s32.totalorder %s56_s17, %s68_s1  ;;  %p73_p1 = scmp.lt.s32.totalorder %s56_s17, %s56_s17 }
   0x7   :  { %p74_p2 = scmp.lt.s32.totalorder %s72_s19, %s68_s1 }
   0x9   :  { %p75_p3 = por %p74_p2, %p73_p1 }
   0xb   :  { %p76_p4 = pnand %p75_p3, %p69_p0 }
  0x83   :  { %v22_v5 = vpop.permute.xlu0 %21 }
  0x84   :  { %vm23_vm1 = vcmp.eq.s32.totalorder %v19_v3, %v22_v5 }
  0x85   :  { %v24_v6 = vsel %vm23_vm1, %v15_v4, 0.0 }
  0x86   :  { %v26_v7 = vsel %vm25_vm0, %v24_v6, 0.0 }
  0x87   :  { %v27_v8 = vrot.slane %v26_v7, 4 }
  0x89   :  { %v28_v9 = vadd.f32 %v27_v8, %v26_v7 }
  0x8b   :  { %v29_v10 = vrot.slane %v28_v9, 2 }
  0x8d   :  { %v30_v11 = vadd.f32 %v29_v10, %v28_v9 }
  0x8f   :  { %v31_v12 = vrot.slane %v30_v11, 1 }
  0x91   :  { %v32_v14 = vadd.f32 %v31_v12, %v30_v11 }
  0x93   :  { %v33_v15 = vmul.f32 %v32_v14, %v16_v13 }
  0x95   :  { %v35_v16 = vsel %vm34_vm2, %v33_v15, 0.0 }
  0x96   :  { %36 = vadd.xlane.f32.xlu0 %v35_v16 }
 0x123   :  { %v37_v17 = vpop.xlane.xlu0 %36 }
 0x124   :  { %v38_v18 = vrot.slane %v37_v17, 4 }
 0x126   :  { %v39_v19 = vadd.f32 %v38_v18, %v37_v17 }
 0x128   :  { %v40_v20 = vrot.slane %v39_v19, 2 }
 0x12a   :  { %v41_v21 = vadd.f32 %v40_v20, %v39_v19 }
 0x12c   :  { %v42_v22 = vrot.slane %v41_v21, 1 }
 0x12e   :  { %v43_v23 = vadd.f32 %v42_v22, %v41_v21 }
 0x130   :  { %63 = vpush %v43_v23 }
 0x161   :  { %s64_s18 = spop %63 }
 0x162   :  { %v46_v24 = vstv %s64_s18 }
 0x163   :  { %v47_v25 = vsel %vm45_vm3, %v46_v24, 0.0 }
 0x164   :  { %48 = vst [vmem:[#allocation2] sm:$0x1] %v47_v25 }
 0x165   :  { %79 = shalt.err (!%p76_p4)
}
 0x166   :  { %s80_s22 = scalar_lea.hbm %s138_s3, 16 }
 0x167   :  { %p81_p5 = scmp.ne.s32.totalorder %s138_s3, %s80_s22  ;;  %p84_p6 = scmp.lt.u32.totalorder %s80_s22, %s138_s3 }
 0x169   :  { %p86_p7 = pnand %p84_p6, %p81_p5 }
 0x16b   :  { %89 = shalt.err (!%p86_p7)
}
 0x16c   :  { %58 = dma.vmem_to_hbm [thread:$0]  %s56_s17, 16, %s138_s3, [#allocation3]  }
 0x16d   :  { %90 = dma.done.wait [#allocation3], 16  }
 0x16e   :  { %91 = vsyncadd [#allocation3], 4294967280 }
 0x16f   :  { %62 = vsyncpa [#allocation3], 1 }

</bundles_post_ra>
